<compile_context>
chip_gen: v5e
topology: v5e:2x2
jax: 0.10.0
libtpu: 0.0.40
codegen_flags: <defaults>
</compile_context>

<pallas_src>
import functools

import jax
import jax.numpy as jnp
from jax import lax
from jax.experimental import pallas as pl
from jax.experimental.pallas import tpu as pltpu

TEMPERATURE = 0.1
_NEG_BIG = -1e30          # mask value; exp(_NEG_BIG - inv_temp) underflows to 0
_EPS_SQ = 1e-24           # (F.normalize eps = 1e-12) squared


def _simclr_kernel(r1_rows_ref, r2_rows_ref, c1t_ref, c2t_ref,
                   out_ref,
                   lhs_ref, l1_ref, l2_ref,
                   *, inv_temp, true_b):
    i = pl.program_id(0)
    j = pl.program_id(1)
    nj = pl.num_programs(1)
    tm = r1_rows_ref.shape[0]
    tn = c1t_ref.shape[1]

    @pl.when(j == 0)
    def _init():
        # Rows arrive already L2-normalized; stage the fused (2*TM, D) LHS
        # once per row tile and zero the running softmax denominators.
        lhs_ref[0:tm, :] = r1_rows_ref[...]
        lhs_ref[tm:2 * tm, :] = r2_rows_ref[...]
        l1_ref[...] = jnp.zeros((tm, 1), jnp.float32)
        l2_ref[...] = jnp.zeros((tm, 1), jnp.float32)

    lhs = lhs_ref[...]                                    # (2*TM, D)
    dn = (((1,), (0,)), ((), ()))                         # canonical (M,K)x(K,N)
    s_c1 = lax.dot_general(lhs, c1t_ref[...], dn,
                           preferred_element_type=jnp.float32) * inv_temp
    s_c2 = lax.dot_general(lhs, c2t_ref[...], dn,
                           preferred_element_type=jnp.float32) * inv_temp

    # Per-view (b-space) indices for the self-similarity / padding masks.
    row_g = lax.broadcasted_iota(jnp.int32, (tm, tn), 0) + i * tm
    col_g = lax.broadcasted_iota(jnp.int32, (tm, tn), 1) + j * tn
    col_invalid = col_g >= true_b
    diag = row_g == col_g

    s11 = jnp.where(diag | col_invalid, _NEG_BIG, s_c1[0:tm, :])       # v1 rows x v1 cols
    s21 = jnp.where(col_invalid, _NEG_BIG, s_c1[tm:2 * tm, :])          # v2 rows x v1 cols
    s12 = jnp.where(col_invalid, _NEG_BIG, s_c2[0:tm, :])               # v1 rows x v2 cols
    s22 = jnp.where(diag | col_invalid, _NEG_BIG, s_c2[tm:2 * tm, :])   # v2 rows x v2 cols

    # Fixed-max softmax: logits <= inv_temp, so exp(s - inv_temp) <= 1.
    # No running max / rescale needed.
    l1_ref[...] += (jnp.sum(jnp.exp(s11 - inv_temp), axis=-1, keepdims=True)
                    + jnp.sum(jnp.exp(s12 - inv_temp), axis=-1, keepdims=True))
    l2_ref[...] += (jnp.sum(jnp.exp(s21 - inv_temp), axis=-1, keepdims=True)
                    + jnp.sum(jnp.exp(s22 - inv_temp), axis=-1, keepdims=True))

    @pl.when(j == nj - 1)
    def _finalize():
        lse1 = inv_temp + jnp.log(l1_ref[...])            # (TM, 1)
        lse2 = inv_temp + jnp.log(l2_ref[...])
        # Positive logit: rowwise dot between the two normalized views.
        pos = jnp.sum(lhs_ref[0:tm, :].astype(jnp.float32)
                      * lhs_ref[tm:2 * tm, :].astype(jnp.float32),
                      axis=-1, keepdims=True) * inv_temp
        row_idx = lax.broadcasted_iota(jnp.int32, (tm, 1), 0) + i * tm
        per_row = jnp.where(row_idx < true_b, lse1 + lse2 - 2.0 * pos, 0.0)
        partial = jnp.sum(per_row)
        # Lane-dense full-block store (no masked vst); wrapper reads [:, 0, 0].
        out_ref[...] = jnp.broadcast_to(partial, out_ref.shape)


def _round_up(x, m):
    return ((x + m - 1) // m) * m


def _cdiv(a, m):
    return -(-a // m)


def _l2_normalize(x):
    ss = jnp.sum(x * x, axis=-1, keepdims=True)
    return x * lax.rsqrt(jnp.maximum(ss, _EPS_SQ))


def _vmem_capacity_bytes():
    try:
        return int(pltpu.get_tpu_info().vmem_capacity_bytes)
    except Exception:
        return 64 << 20   # conservative fallback (v7x physical VMEM)


def _plan_tiles(b, d, itemsize, vmem_cap):
    """Pick (tm, gi, tn, gj, vmem_limit) for the (row, column) grid."""
    sub = 16 if itemsize == 2 else 8

    def plan_bytes(tm_, tn_, gj_):
        nbuf = 2 if gj_ < 3 else 3
        rows = 2 * 2 * tm_ * d * itemsize                     # 2 views, double-buffered
        cols = 2 * nbuf * d * tn_ * itemsize                  # 2 views, nbuf-deep
        scratch = 2 * tm_ * d * itemsize + 2 * tm_ * 128 * 4  # lhs + lane-padded l1/l2
        temps = 6 * (2 * tm_) * tn_ * 4                       # sim blocks + exp/where temps
        out = 2 * 8 * 128 * 4
        return rows + cols + scratch + temps + out

    budget = int(0.55 * vmem_cap)

    # Row tile: as big as possible — column tiles are re-read from HBM
    # gi = ceil(b / tm) times, so tm is the dominant HBM-traffic lever.
    b_r = _round_up(b, sub)
    if b_r <= 512:
        if b >= 256:
            tm, gi = _round_up(_cdiv(b, 2), sub), 2   # keep gi >= 2 for v7x megacore
        else:
            tm, gi = b_r, 1
    else:
        tm, gi = 512, _cdiv(b, 512)

    # Column tile: keep the whole (D, B) operand resident (gj = 1) when the
    # plan (incl. temporaries) fits; otherwise stream lane-dense tiles.
    tn_full = _round_up(b, 128)
    if plan_bytes(tm, tn_full, 1) <= budget:
        tn, gj = tn_full, 1
    else:
        tn = 256 if b > 128 else tn_full
        gj = _cdiv(b, tn)
        while plan_bytes(tm, tn, gj) > budget:
            if tn > 128:
                tn //= 2
            elif tm > sub:
                tm = max(sub, (tm // 2 // sub) * sub)
                gi = _cdiv(b, tm)
            else:
                break
            gj = _cdiv(b, tn)

    vmem_limit = int(min(vmem_cap, max(32 << 20, plan_bytes(tm, tn, gj) + (8 << 20))))
    return tm, gi, tn, gj, vmem_limit


def simclr_loss(representations_1: jax.Array,
                representations_2: jax.Array,
                temperature: float = TEMPERATURE,
                *, use_bf16_matmul: bool = False) -> jax.Array:
    """NT-Xent (SimCLR) loss; representations_* are (B, D) float arrays."""
    b, d = representations_1.shape
    assert representations_2.shape == (b, d)
    n = 2 * b
    inv_temp = 1.0 / float(temperature)

    r1 = representations_1.astype(jnp.float32)
    r2 = representations_2.astype(jnp.float32)

    # Hoisted out of the kernel: one fused XLA pass normalizes both views; the
    # kernel only ever sees unit-norm rows (this also enables the fixed-max
    # softmax below, since all cosine similarities are <= 1).
    xn1 = _l2_normalize(r1)
    xn2 = _l2_normalize(r2)

    op_dtype = jnp.bfloat16 if use_bf16_matmul else jnp.float32
    itemsize = jnp.dtype(op_dtype).itemsize

    vmem_cap = _vmem_capacity_bytes()
    tm, gi, tn, gj, vmem_limit = _plan_tiles(b, d, itemsize, vmem_cap)
    b_padr = gi * tm
    b_padc = gj * tn

    def pad_rows(x, rows):
        return jnp.pad(x, ((0, rows - b), (0, 0))) if rows != b else x

    rows1 = pad_rows(xn1, b_padr).astype(op_dtype)
    rows2 = pad_rows(xn2, b_padr).astype(op_dtype)
    # Pre-transposed column operand -> canonical (2*TM, D) x (D, TN) matmul.
    cols1 = pad_rows(xn1, b_padc).astype(op_dtype).T
    cols2 = pad_rows(xn2, b_padc).astype(op_dtype).T

    kernel = functools.partial(_simclr_kernel, inv_temp=inv_temp, true_b=b)

    col_kwargs = {}
    if gj >= 3:
        # Deeper column prefetch when streaming (hides HBM latency on v5e).
        col_kwargs = dict(pipeline_mode=pl.Buffered(3))
    col_spec1 = pl.BlockSpec((d, tn), lambda i, j: (0, j), **col_kwargs)
    col_spec2 = pl.BlockSpec((d, tn), lambda i, j: (0, j), **col_kwargs)

    cost = pl.CostEstimate(
        flops=int(8 * b_padr * b_padc * d + 12 * n * d),
        transcendentals=int(4 * b_padr * b_padc + 4 * n),
        bytes_accessed=int(itemsize * 2 * d * (b_padr + gi * b_padc) + 4 * gi * 8 * 128),
    )

    partials = pl.pallas_call(
        kernel,
        out_shape=jax.ShapeDtypeStruct((gi, 8, 128), jnp.float32),
        grid_spec=pltpu.PrefetchScalarGridSpec(
            num_scalar_prefetch=0,
            grid=(gi, gj),
            in_specs=[
                pl.BlockSpec((tm, d), lambda i, j: (i, 0)),   # view-1 row tile
                pl.BlockSpec((tm, d), lambda i, j: (i, 0)),   # view-2 row tile
                col_spec1,                                    # view-1 columns (D, TN)
                col_spec2,                                    # view-2 columns (D, TN)
            ],
            out_specs=pl.BlockSpec((1, 8, 128), lambda i, j: (i, 0, 0)),
            scratch_shapes=[
                pltpu.VMEM((2 * tm, d), op_dtype),   # fused normalized LHS rows
                pltpu.VMEM((tm, 1), jnp.float32),    # l1: view-1 rows' sum-exp
                pltpu.VMEM((tm, 1), jnp.float32),    # l2: view-2 rows' sum-exp
            ],
        ),
        compiler_params=pltpu.CompilerParams(
            dimension_semantics=("parallel", "arbitrary"),
            vmem_limit_bytes=vmem_limit,
        ),
        cost_estimate=cost,
    )(rows1, rows2, cols1, cols2)

    return jnp.sum(partials[:, 0, 0]) / jnp.float32(n)


if __name__ == "__main__":
    # Pure-JAX reference matching the PyTorch module semantics.
    def ref(r1, r2, temp=TEMPERATURE):
        bb, dd = r1.shape
        reps = jnp.stack([r1, r2], axis=1).reshape(2 * bb, dd)
        reps = reps / jnp.maximum(jnp.linalg.norm(reps, axis=1, keepdims=True), 1e-12)
        sim = reps @ reps.T / temp
        nn = sim.shape[0]
        sim = jnp.where(jnp.eye(nn, dtype=bool), jnp.finfo(jnp.float32).min, sim)
        logp = jax.nn.log_softmax(sim, axis=1)
        tgt = jnp.arange(nn) ^ 1
        return -jnp.mean(logp[jnp.arange(nn), tgt])

    key = jax.random.PRNGKey(0)

    # Small case (single tile, resident columns).
    k1, k2, k3, k4 = jax.random.split(key, 4)
    B, D = 8, 32
    reps1 = jax.random.normal(k1, (B, D), dtype=jnp.float32)
    reps2 = jax.random.normal(k2, (B, D), dtype=jnp.float32)
    loss = simclr_loss(reps1, reps2)
    jax.block_until_ready(loss)
    ref_loss = ref(reps1, reps2)
    assert jnp.allclose(loss, ref_loss, rtol=1e-4, atol=1e-4), (loss, ref_loss)

    # Larger, non-tile-multiple case (exercises gi=2, row/column padding masks).
    B2, D2 = 300, 64
    reps1b = jax.random.normal(k3, (B2, D2), dtype=jnp.float32)
    reps2b = jax.random.normal(k4, (B2, D2), dtype=jnp.float32)
    loss2 = simclr_loss(reps1b, reps2b)
    jax.block_until_ready(loss2)
    ref_loss2 = ref(reps1b, reps2b)
    assert jnp.allclose(loss2, ref_loss2, rtol=1e-4, atol=1e-4), (loss2, ref_loss2)

    print("KERNEL_OK")
</pallas_src>

<mosaic_0001>
module attributes {stable_mosaic.version = 11 : i64} {
  func.func @_simclr_kernel(%arg0: i32, %arg1: i32, %arg2: memref<8x32xf32, #tpu.memory_space<vmem>>, %arg3: memref<8x32xf32, #tpu.memory_space<vmem>>, %arg4: memref<32x128xf32, #tpu.memory_space<vmem>>, %arg5: memref<32x128xf32, #tpu.memory_space<vmem>>, %arg6: memref<1x8x128xf32, #tpu.memory_space<vmem>>, %arg7: memref<16x32xf32, #tpu.memory_space<vmem>>, %arg8: memref<8x1xf32, #tpu.memory_space<vmem>>, %arg9: memref<8x1xf32, #tpu.memory_space<vmem>>) attributes {dimension_semantics = [#tpu.dimension_semantics<parallel>, #tpu.dimension_semantics<arbitrary>], iteration_bounds = array<i64: 1, 1>, scalar_prefetch = 0 : i64, scratch_operands = 3 : i64, tpu.core_type = #tpu.core_type<tc>, window_params = [{transform_indices = @transform_0, window_bounds = array<i64: 8, 32>}, {transform_indices = @transform_1, window_bounds = array<i64: 8, 32>}, {transform_indices = @transform_2, window_bounds = array<i64: 32, 128>}, {transform_indices = @transform_3, window_bounds = array<i64: 32, 128>}, {transform_indices = @transform_4, window_bounds = array<i64: 1, 8, 128>}]} {
    %c0_i32 = arith.constant 0 : i32
    %0 = arith.cmpi eq, %arg1, %c0_i32 : i32
    %1 = arith.extui %0 : i1 to i32
    %c0_i32_0 = arith.constant 0 : i32
    %2 = arith.cmpi ne, %1, %c0_i32_0 : i32
    scf.if %2 {
      %c0_32 = arith.constant 0 : index
      %c0_33 = arith.constant 0 : index
      %68 = vector.load %arg2[%c0_32, %c0_33] : memref<8x32xf32, #tpu.memory_space<vmem>>, vector<8x32xf32>
      %c0_34 = arith.constant 0 : index
      %c0_35 = arith.constant 0 : index
      %69 = vector.load %arg7[%c0_34, %c0_35] : memref<16x32xf32, #tpu.memory_space<vmem>>, vector<8x32xf32>
      tpu.vector_store %arg7[%c0_34, %c0_35], %68 {strides = array<i32>} : memref<16x32xf32, #tpu.memory_space<vmem>>, vector<8x32xf32>,
      %c0_36 = arith.constant 0 : index
      %c0_37 = arith.constant 0 : index
      %70 = vector.load %arg3[%c0_36, %c0_37] : memref<8x32xf32, #tpu.memory_space<vmem>>, vector<8x32xf32>
      %c8 = arith.constant 8 : index
      %c0_38 = arith.constant 0 : index
      %71 = vector.load %arg7[%c8, %c0_38] : memref<16x32xf32, #tpu.memory_space<vmem>>, vector<8x32xf32>
      tpu.vector_store %arg7[%c8, %c0_38], %70 {strides = array<i32>} : memref<16x32xf32, #tpu.memory_space<vmem>>, vector<8x32xf32>,
      %cst_39 = arith.constant 0.000000e+00 : f32
      %72 = vector.broadcast %cst_39 : f32 to vector<8x1xf32>
      %c0_40 = arith.constant 0 : index
      %c0_41 = arith.constant 0 : index
      %73 = vector.load %arg8[%c0_40, %c0_41] : memref<8x1xf32, #tpu.memory_space<vmem>>, vector<8x1xf32>
      tpu.vector_store %arg8[%c0_40, %c0_41], %72 {strides = array<i32>} : memref<8x1xf32, #tpu.memory_space<vmem>>, vector<8x1xf32>,
      %cst_42 = arith.constant 0.000000e+00 : f32
      %74 = vector.broadcast %cst_42 : f32 to vector<8x1xf32>
      %c0_43 = arith.constant 0 : index
      %c0_44 = arith.constant 0 : index
      %75 = vector.load %arg9[%c0_43, %c0_44] : memref<8x1xf32, #tpu.memory_space<vmem>>, vector<8x1xf32>
      tpu.vector_store %arg9[%c0_43, %c0_44], %74 {strides = array<i32>} : memref<8x1xf32, #tpu.memory_space<vmem>>, vector<8x1xf32>,
    } else {
    }
    %c0 = arith.constant 0 : index
    %c0_1 = arith.constant 0 : index
    %3 = vector.load %arg7[%c0, %c0_1] : memref<16x32xf32, #tpu.memory_space<vmem>>, vector<16x32xf32>
    %c0_2 = arith.constant 0 : index
    %c0_3 = arith.constant 0 : index
    %4 = vector.load %arg4[%c0_2, %c0_3] : memref<32x128xf32, #tpu.memory_space<vmem>>, vector<32x128xf32>
    %cst = arith.constant dense<0.000000e+00> : vector<16x128xf32>
    %5 = tpu.matmul %3, %4, %cst {dimension_numbers = #tpu.dot_dimension_numbers<[1], [0], [0], [1], [0, 0, 1, 1], [], []>} : vector<16x32xf32>, vector<32x128xf32>, vector<16x128xf32> -> vector<16x128xf32>
    %cst_4 = arith.constant 1.000000e+01 : f32
    %6 = vector.broadcast %cst_4 : f32 to vector<16x128xf32>
    %7 = arith.mulf %5, %6 : vector<16x128xf32>
    %c0_5 = arith.constant 0 : index
    %c0_6 = arith.constant 0 : index
    %8 = vector.load %arg5[%c0_5, %c0_6] : memref<32x128xf32, #tpu.memory_space<vmem>>, vector<32x128xf32>
    %cst_7 = arith.constant dense<0.000000e+00> : vector<16x128xf32>
    %9 = tpu.matmul %3, %8, %cst_7 {dimension_numbers = #tpu.dot_dimension_numbers<[1], [0], [0], [1], [0, 0, 1, 1], [], []>} : vector<16x32xf32>, vector<32x128xf32>, vector<16x128xf32> -> vector<16x128xf32>
    %cst_8 = arith.constant 1.000000e+01 : f32
    %10 = vector.broadcast %cst_8 : f32 to vector<16x128xf32>
    %11 = arith.mulf %9, %10 : vector<16x128xf32>
    %12 = tpu.iota {dimensions = array<i32: 0>} : vector<8x128xi32>
    %c8_i32 = arith.constant 8 : i32
    %13 = arith.muli %arg0, %c8_i32 : i32
    %14 = vector.broadcast %13 : i32 to vector<8x128xi32>
    %15 = arith.addi %12, %14 : vector<8x128xi32>
    %16 = tpu.iota {dimensions = array<i32: 1>} : vector<8x128xi32>
    %c128_i32 = arith.constant 128 : i32
    %17 = arith.muli %arg1, %c128_i32 : i32
    %18 = vector.broadcast %17 : i32 to vector<8x128xi32>
    %19 = arith.addi %16, %18 : vector<8x128xi32>
    %c8_i32_9 = arith.constant 8 : i32
    %20 = vector.broadcast %c8_i32_9 : i32 to vector<8x128xi32>
    %21 = arith.cmpi sge, %19, %20 : vector<8x128xi32>
    %22 = arith.cmpi eq, %15, %19 : vector<8x128xi32>
    %23 = arith.ori %22, %21 : vector<8x128xi1>
    %24 = vector.extract_strided_slice %7 {offsets = [0, 0], sizes = [8, 128], strides = [1, 1]} : vector<16x128xf32> to vector<8x128xf32>
    %cst_10 = arith.constant -1.000000e+30 : f32
    %25 = vector.broadcast %cst_10 : f32 to vector<8x128xf32>
    %26 = arith.select %23, %25, %24 : vector<8x128xi1>, vector<8x128xf32>
    %27 = vector.extract_strided_slice %7 {offsets = [8, 0], sizes = [8, 128], strides = [1, 1]} : vector<16x128xf32> to vector<8x128xf32>
    %cst_11 = arith.constant -1.000000e+30 : f32
    %28 = vector.broadcast %cst_11 : f32 to vector<8x128xf32>
    %29 = arith.select %21, %28, %27 : vector<8x128xi1>, vector<8x128xf32>
    %30 = vector.extract_strided_slice %11 {offsets = [0, 0], sizes = [8, 128], strides = [1, 1]} : vector<16x128xf32> to vector<8x128xf32>
    %cst_12 = arith.constant -1.000000e+30 : f32
    %31 = vector.broadcast %cst_12 : f32 to vector<8x128xf32>
    %32 = arith.select %21, %31, %30 : vector<8x128xi1>, vector<8x128xf32>
    %33 = arith.ori %22, %21 : vector<8x128xi1>
    %34 = vector.extract_strided_slice %11 {offsets = [8, 0], sizes = [8, 128], strides = [1, 1]} : vector<16x128xf32> to vector<8x128xf32>
    %cst_13 = arith.constant -1.000000e+30 : f32
    %35 = vector.broadcast %cst_13 : f32 to vector<8x128xf32>
    %36 = arith.select %33, %35, %34 : vector<8x128xi1>, vector<8x128xf32>
    %c0_14 = arith.constant 0 : index
    %c0_15 = arith.constant 0 : index
    %37 = vector.load %arg8[%c0_14, %c0_15] : memref<8x1xf32, #tpu.memory_space<vmem>>, vector<8x1xf32>
    %cst_16 = arith.constant 1.000000e+01 : f32
    %38 = vector.broadcast %cst_16 : f32 to vector<8x128xf32>
    %39 = arith.subf %26, %38 : vector<8x128xf32>
    %40 = math.exp %39 : vector<8x128xf32>
    %cst_17 = arith.constant dense<0.000000e+00> : vector<8xf32>
    %41 = vector.multi_reduction <add>, %40, %cst_17 [1] : vector<8x128xf32> to vector<8xf32>
    %42 = vector.shape_cast %41 : vector<8xf32> to vector<8x1xf32>
    %cst_18 = arith.constant 1.000000e+01 : f32
    %43 = vector.broadcast %cst_18 : f32 to vector<8x128xf32>
    %44 = arith.subf %32, %43 : vector<8x128xf32>
    %45 = math.exp %44 : vector<8x128xf32>
    %cst_19 = arith.constant dense<0.000000e+00> : vector<8xf32>
    %46 = vector.multi_reduction <add>, %45, %cst_19 [1] : vector<8x128xf32> to vector<8xf32>
    %47 = vector.shape_cast %46 : vector<8xf32> to vector<8x1xf32>
    %48 = arith.addf %42, %47 : vector<8x1xf32>
    %49 = arith.addf %37, %48 : vector<8x1xf32>
    %c0_20 = arith.constant 0 : index
    %c0_21 = arith.constant 0 : index
    %50 = vector.load %arg8[%c0_20, %c0_21] : memref<8x1xf32, #tpu.memory_space<vmem>>, vector<8x1xf32>
    tpu.vector_store %arg8[%c0_20, %c0_21], %49 {strides = array<i32>} : memref<8x1xf32, #tpu.memory_space<vmem>>, vector<8x1xf32>,
    %c0_22 = arith.constant 0 : index
    %c0_23 = arith.constant 0 : index
    %51 = vector.load %arg9[%c0_22, %c0_23] : memref<8x1xf32, #tpu.memory_space<vmem>>, vector<8x1xf32>
    %cst_24 = arith.constant 1.000000e+01 : f32
    %52 = vector.broadcast %cst_24 : f32 to vector<8x128xf32>
    %53 = arith.subf %29, %52 : vector<8x128xf32>
    %54 = math.exp %53 : vector<8x128xf32>
    %cst_25 = arith.constant dense<0.000000e+00> : vector<8xf32>
    %55 = vector.multi_reduction <add>, %54, %cst_25 [1] : vector<8x128xf32> to vector<8xf32>
    %56 = vector.shape_cast %55 : vector<8xf32> to vector<8x1xf32>
    %cst_26 = arith.constant 1.000000e+01 : f32
    %57 = vector.broadcast %cst_26 : f32 to vector<8x128xf32>
    %58 = arith.subf %36, %57 : vector<8x128xf32>
    %59 = math.exp %58 : vector<8x128xf32>
    %cst_27 = arith.constant dense<0.000000e+00> : vector<8xf32>
    %60 = vector.multi_reduction <add>, %59, %cst_27 [1] : vector<8x128xf32> to vector<8xf32>
    %61 = vector.shape_cast %60 : vector<8xf32> to vector<8x1xf32>
    %62 = arith.addf %56, %61 : vector<8x1xf32>
    %63 = arith.addf %51, %62 : vector<8x1xf32>
    %c0_28 = arith.constant 0 : index
    %c0_29 = arith.constant 0 : index
    %64 = vector.load %arg9[%c0_28, %c0_29] : memref<8x1xf32, #tpu.memory_space<vmem>>, vector<8x1xf32>
    tpu.vector_store %arg9[%c0_28, %c0_29], %63 {strides = array<i32>} : memref<8x1xf32, #tpu.memory_space<vmem>>, vector<8x1xf32>,
    %c0_i32_30 = arith.constant 0 : i32
    %65 = arith.cmpi eq, %arg1, %c0_i32_30 : i32
    %66 = arith.extui %65 : i1 to i32
    %c0_i32_31 = arith.constant 0 : i32
    %67 = arith.cmpi ne, %66, %c0_i32_31 : i32
    scf.if %67 {
      %c0_32 = arith.constant 0 : index
      %c0_33 = arith.constant 0 : index
      %68 = vector.load %arg8[%c0_32, %c0_33] : memref<8x1xf32, #tpu.memory_space<vmem>>, vector<8x1xf32>
      %69 = math.log %68 : vector<8x1xf32>
      %cst_34 = arith.constant 1.000000e+01 : f32
      %70 = vector.broadcast %cst_34 : f32 to vector<8x1xf32>
      %71 = arith.addf %70, %69 : vector<8x1xf32>
      %c0_35 = arith.constant 0 : index
      %c0_36 = arith.constant 0 : index
      %72 = vector.load %arg9[%c0_35, %c0_36] : memref<8x1xf32, #tpu.memory_space<vmem>>, vector<8x1xf32>
      %73 = math.log %72 : vector<8x1xf32>
      %cst_37 = arith.constant 1.000000e+01 : f32
      %74 = vector.broadcast %cst_37 : f32 to vector<8x1xf32>
      %75 = arith.addf %74, %73 : vector<8x1xf32>
      %c0_38 = arith.constant 0 : index
      %c0_39 = arith.constant 0 : index
      %76 = vector.load %arg7[%c0_38, %c0_39] : memref<16x32xf32, #tpu.memory_space<vmem>>, vector<8x32xf32>
      %c8 = arith.constant 8 : index
      %c0_40 = arith.constant 0 : index
      %77 = vector.load %arg7[%c8, %c0_40] : memref<16x32xf32, #tpu.memory_space<vmem>>, vector<8x32xf32>
      %78 = arith.mulf %76, %77 : vector<8x32xf32>
      %cst_41 = arith.constant dense<0.000000e+00> : vector<8xf32>
      %79 = vector.multi_reduction <add>, %78, %cst_41 [1] : vector<8x32xf32> to vector<8xf32>
      %80 = vector.shape_cast %79 : vector<8xf32> to vector<8x1xf32>
      %cst_42 = arith.constant 1.000000e+01 : f32
      %81 = vector.broadcast %cst_42 : f32 to vector<8x1xf32>
      %82 = arith.mulf %80, %81 : vector<8x1xf32>
      %83 = tpu.iota {dimensions = array<i32: 0>} : vector<8x1xi32>
      %c8_i32_43 = arith.constant 8 : i32
      %84 = arith.muli %arg0, %c8_i32_43 : i32
      %85 = vector.broadcast %84 : i32 to vector<8x1xi32>
      %86 = arith.addi %83, %85 : vector<8x1xi32>
      %c8_i32_44 = arith.constant 8 : i32
      %87 = vector.broadcast %c8_i32_44 : i32 to vector<8x1xi32>
      %88 = arith.cmpi slt, %86, %87 : vector<8x1xi32>
      %89 = arith.addf %71, %75 : vector<8x1xf32>
      %cst_45 = arith.constant 2.000000e+00 : f32
      %90 = vector.broadcast %cst_45 : f32 to vector<8x1xf32>
      %91 = arith.mulf %90, %82 : vector<8x1xf32>
      %92 = arith.subf %89, %91 : vector<8x1xf32>
      %cst_46 = arith.constant 0.000000e+00 : f32
      %93 = vector.broadcast %cst_46 : f32 to vector<8x1xf32>
      %94 = arith.select %88, %92, %93 : vector<8x1xi1>, vector<8x1xf32>
      %95 = vector.shape_cast %94 : vector<8x1xf32> to vector<1x8x1xf32>
      %cst_47 = arith.constant dense<0.000000e+00> : vector<1xf32>
      %96 = vector.multi_reduction <add>, %95, %cst_47 [1, 2] : vector<1x8x1xf32> to vector<1xf32>
      %97 = vector.shape_cast %96 : vector<1xf32> to vector<1x1x1xf32>
      %98 = vector.extract %97[0, 0, 0] : f32 from vector<1x1x1xf32>
      %99 = vector.broadcast %98 : f32 to vector<1x8x128xf32>
      %c0_48 = arith.constant 0 : index
      %c0_49 = arith.constant 0 : index
      %c0_50 = arith.constant 0 : index
      %100 = vector.load %arg6[%c0_48, %c0_49, %c0_50] : memref<1x8x128xf32, #tpu.memory_space<vmem>>, vector<1x8x128xf32>
      tpu.vector_store %arg6[%c0_48, %c0_49, %c0_50], %99 {strides = array<i32>} : memref<1x8x128xf32, #tpu.memory_space<vmem>>, vector<1x8x128xf32>,
    } else {
    }
    return
  }
  func.func @transform_0(%arg0: i32, %arg1: i32) -> (i32, i32) {
    %c0_i32 = arith.constant 0 : i32
    %c0_i32_0 = arith.constant 0 : i32
    return %arg0, %c0_i32 : i32, i32
  }
  func.func @transform_1(%arg0: i32, %arg1: i32) -> (i32, i32) {
    %c0_i32 = arith.constant 0 : i32
    %c0_i32_0 = arith.constant 0 : i32
    return %arg0, %c0_i32 : i32, i32
  }
  func.func @transform_2(%arg0: i32, %arg1: i32) -> (i32, i32) {
    %c0_i32 = arith.constant 0 : i32
    %c0_i32_0 = arith.constant 0 : i32
    return %c0_i32, %arg1 : i32, i32
  }
  func.func @transform_3(%arg0: i32, %arg1: i32) -> (i32, i32) {
    %c0_i32 = arith.constant 0 : i32
    %c0_i32_0 = arith.constant 0 : i32
    return %c0_i32, %arg1 : i32, i32
  }
  func.func @transform_4(%arg0: i32, %arg1: i32) -> (i32, i32, i32) {
    %c0_i32 = arith.constant 0 : i32
    %c0_i32_0 = arith.constant 0 : i32
    %c0_i32_1 = arith.constant 0 : i32
    return %arg0, %c0_i32, %c0_i32_0 : i32, i32, i32
  }
}

</mosaic_0001>

<bundles_post_ra>
// kernel: tpu_custom_call.1
= control target key start
LH: loop header
LB: loop body
LE: loop exit
PB: predicated region body
PF: predicated region fallthrough
CT: control target
= control target key end

     0   :  { %9 = vsyncpa [#allocation6], 0  ;;  %s493_s0 = inlined_call_operand.hbm [shape: f32[8,32], index: 0, kind: input, shape index: {}]   ;;  %s494_s1 = inlined_call_operand.hbm [shape: f32[8,32], index: 1, kind: input, shape index: {}]   ;;  %s495_s2 = inlined_call_operand.hbm [shape: f32[32,128], index: 2, kind: input, shape index: {}]   ;;  %s496_s3 = inlined_call_operand.hbm [shape: f32[32,128], index: 3, kind: input, shape index: {}]   ;;  %s497_s4 = inlined_call_operand.hbm [shape: f32[1,8,128], index: 4, kind: output, shape index: {}]  }
   0x1   :  { %10 = vsyncpa [#allocation9], 0 }
   0x2   :  { %11 = vsyncpa [#allocation12], 0  ;;  %s29_s17 = sshll.u32 %s494_s1, 4  ;;  %s30_s17 = int_to_ptr.hbm [resolvable:$true] %s29_s17 }
   0x3   :  { %12 = vsyncpa [#allocation7], 0  ;;  %s422_s18 = smov [#allocation8]   ;;  %s18_s22 = sshll.u32 %s493_s0, 4  ;;  %s19_s22 = int_to_ptr.hbm [resolvable:$true] %s18_s22 }
   0x4   :  { %s31_s19 = sshll.u32 %s422_s18, 4  ;;  %s423_s23 = smov [#allocation5]   ;;  %s32_s19 = int_to_ptr.vmem [resolvable:$true] %s31_s19 }
   0x5   :  { %34 = dma.hbm_to_vmem [thread:$0]  %s30_s17, 128, %s32_s19, [#allocation9]  }
   0x6   :  { %s20_s24 = sshll.u32 %s423_s23, 4  ;;  %s39_s27 = sshll.u32 %s495_s2, 4  ;;  %s21_s24 = int_to_ptr.vmem [resolvable:$true] %s20_s24  ;;  %s40_s27 = int_to_ptr.hbm [resolvable:$true] %s39_s27 }
   0x7   :  { %23 = dma.hbm_to_vmem [thread:$0]  %s19_s22, 128, %s21_s24, [#allocation6]  }
   0x8   :  { %s424_s1 = smov [#allocation10]   ;;  %s52_s5 = sshll.u32 %s496_s3, 4  ;;  %s53_s5 = int_to_ptr.hbm [resolvable:$true] %s52_s5 }
   0x9   :  { %s41_s28 = sshll.u32 %s424_s1, 4  ;;  %s425_s6 = smov 128   ;;  %s42_s28 = int_to_ptr.vmem [resolvable:$true] %s41_s28 }
   0xa   :  { %s426_s0 = smov 8   ;;  %s427_s7 = smov [#allocation11]  }
   0xb   :  { %47 = dma.hbm_to_vmem [thread:$0]  %s40_s27, 512, %s42_s28, [#allocation9], %s425_s6, %s425_s6, %s426_s0  }
   0xc   :  { %s54_s8 = sshll.u32 %s427_s7, 4  ;;  %s55_s8 = int_to_ptr.vmem [resolvable:$true] %s54_s8 }
   0xd   :  { %60 = dma.hbm_to_vmem [thread:$0]  %s53_s5, 512, %s55_s8, [#allocation12], %s425_s6, %s425_s6, %s426_s0  }
   0xe   :  { %414 = dma.done.wait [#allocation6], 128  }
   0xf   :  { %415 = vsyncadd [#allocation6], 4294967168 }
  0x10   :  { %416 = dma.done.wait [#allocation9], 640  }
  0x11   :  { %417 = vsyncadd [#allocation9], 4294966656 }
  0x12   :  { %418 = dma.done.wait [#allocation12], 512  }
  0x13   :  { %419 = vsyncadd [#allocation12], 4294966784  ;;  %vm82_vm0 = vcmask 261120   ;;  %v94_v0 = vld [vmem:[#allocation10 + $0x18] sm:$0xff]  ;;  %v93_v1 = vld [vmem:[#allocation10 + $0x10] sm:$0xff]  ;;  %v156_v12 = vlaneseq  ;;  %vm86_vm4 = vcmask 7168  }
  0x14   :  { %114 = vmatpush.msra.mxu0 %v94_v0  ;;  %264 = vmatpush.msra.mxu2 %v94_v0  ;;  %v81_v2 = vld [vmem:[#allocation5] sm:$0xff]  ;;  %v84_v3 = vld [vmem:[#allocation8] sm:$0xff]  ;;  %v92_v4 = vld [vmem:[#allocation10 + $0x8] sm:$0xff]  ;;  %v428_v42 = vmov 0.0   ;;  %s429_s2 = smov [#allocation13]   ;;  %s244_s11 = sshll.u32 %s497_s4, 4  ;;  %s245_s11 = int_to_ptr.hbm [resolvable:$true] %s244_s11 }
  0x15   :  { %83 = vst.msk [vmem:[#allocation2] sm:$0xff] %vm82_vm0, %v81_v2  ;;  %v130_v5 = vld [vmem:[#allocation11 + $0x18] sm:$0xff]  ;;  %v129_v6 = vld [vmem:[#allocation11 + $0x10] sm:$0xff]  ;;  %v91_v7 = vld [vmem:[#allocation10] sm:$0xff]  ;;  %v157_v13 = vshrl.u32 %v156_v12, 7  ;;  %v162_v14 = vand.u32 127, %v156_v12 }
  0x16   :  { %115 = vmatpush.msra.mxu0 %v93_v1  ;;  %265 = vmatpush.msra.mxu2 %v93_v1  ;;  %85 = vst.msk [vmem:[#allocation2 + $0x8] sm:$0xff] %vm82_vm0, %v84_v3  ;;  %v128_v8 = vld [vmem:[#allocation11 + $0x8] sm:$0xff]  ;;  %v127_v9 = vld [vmem:[#allocation11] sm:$0xff]  ;;  %s242_s3 = sshll.u32 %s429_s2, 4  ;;  %s243_s3 = int_to_ptr.vmem [resolvable:$true] %s242_s3 }
  0x17   :  { %143 = vmatpush.msra.mxu1 %v130_v5  ;;  %268 = vmatpush.msra.mxu3 %v130_v5  ;;  %vm166_vm1 = vcmp.ge.s32.totalorder %v162_v14, 8  ;;  %vm167_vm2 = vcmp.eq.s32.totalorder %v157_v13, %v162_v14  ;;  %87 = vst.msk [vmem:[#allocation3] sm:$0xff] %vm86_vm4, %v428_v42 }
  0x18   :  { %116 = vmatpush.msra.mxu0 %v92_v4  ;;  %266 = vmatpush.msra.mxu2 %v92_v4  ;;  %vm474_vm3 = vmor %vm167_vm2, %vm166_vm1  ;;  %88 = vst.msk [vmem:[#allocation4] sm:$0xff] %vm86_vm4, %v428_v42 }
  0x19   :  { %144 = vmatpush.msra.mxu1 %v129_v6  ;;  %269 = vmatpush.msra.mxu3 %v129_v6 }
  0x1a   :  { %117 = vmatpush.msra.mxu0 %v91_v7  ;;  %267 = vmatpush.msra.mxu2 %v91_v7 }
  0x1b   :  { %145 = vmatpush.msra.mxu1 %v128_v8  ;;  %270 = vmatpush.msra.mxu3 %v128_v8 }
  0x1c   :  { %v89_v10 = vld [vmem:[#allocation2] sm:$0xff] }
  0x1d   :  { %256 = vmatmul.msk.f32.vlgmr.msra.gmra.mxu0 %vm82_vm0, %v89_v10  ;;  %v90_v11 = vld [vmem:[#allocation2 + $0x8] sm:$0xff]  ;;  %146 = vmatpush.msra.mxu1 %v127_v9 }
  0x1e   :  { %257 = vmatmul.msk.f32.vlgmr.msra.gmra.mxu2 %vm82_vm0, %v90_v11  ;;  %271 = vmatpush.msra.mxu3 %v127_v9  ;;  %v215_v15 = vmul.f32 %v90_v11, %v89_v10  ;;  %v173_v45 = vld [vmem:[#allocation3] sm:$0xff] }
  0x1f   :  { %258 = vmatmul.msk.f32.vlgmr.msra.gmra.mxu1 %vm82_vm0, %v89_v10  ;;  %259 = vmatmul.msk.f32.vlgmr.msra.gmra.mxu3 %vm82_vm0, %v90_v11  ;;  %v188_v49 = vld [vmem:[#allocation4] sm:$0xff] }
  0x20   :  { %v216_v18 = vsel %vm82_vm0, %v215_v15, 0.0 }
  0x21   :  { %217 = vadd.xlane.f32.xlu2 %v216_v18 }
  0x94   :  { %v218_v56 = vpop.xlane.xlu2 %217 }
  0x95   :  { %v219_v57 = vmul.f32 10.0, %v218_v56 }
  0x97   :  { %v222_v61 = vmul.f32 2.0, %v219_v57 }
  0x9a   :  { %v119_v16 = vpop.f32.mrf.mxu0 }
  0x9b   :  { %v125_v19 = vmul.f32 10.0, %v119_v16 }
  0x9c   :  { %v148_v20 = vpop.f32.mrf.mxu1 }
  0x9d   :  { %v169_v21 = vsel %vm474_vm3, -1e+30, %v125_v19  ;;  %v154_v22 = vmul.f32 10.0, %v148_v20 }
  0x9e   :  { %v260_v23 = vadd.f32 -10.0, %v169_v21 }
  0x9f   :  { %v171_v24 = vsel %vm166_vm1, -1e+30, %v154_v22 }
  0xa0   :  { %v261_v25 = vadd.f32 -10.0, %v171_v24  ;;  %v175_v26 = vmul.f32 1.442695, %v260_v23 }
  0xa1   :  { %v122_v27 = vpop.f32.mrf.mxu2 }
  0xa2   :  { %v126_v28 = vmul.f32 10.0, %v122_v27  ;;  %v151_v29 = vpop.f32.mrf.mxu3  ;;  %282 = vpow2.f32 %v175_v26  ;;  %v180_v32 = vmul.f32 1.442695, %v261_v25 }
  0xa3   :  { %v155_v30 = vmul.f32 10.0, %v151_v29 }
  0xa4   :  { %v170_v31 = vsel %vm166_vm1, -1e+30, %v126_v28  ;;  %284 = vpow2.f32 %v180_v32 }
  0xa5   :  { %v262_v33 = vadd.f32 -10.0, %v170_v31  ;;  %v172_v34 = vsel %vm474_vm3, -1e+30, %v155_v30 }
  0xa6   :  { %v263_v35 = vadd.f32 -10.0, %v172_v34 }
  0xa7   :  { %v190_v36 = vmul.f32 1.442695, %v262_v33 }
  0xa8   :  { %v283_v37 = vpop.eup %282  ;;  %v195_v38 = vmul.f32 1.442695, %v263_v35 }
  0xa9   :  { %177 = vadd.xlane.f32.xlu0 %v283_v37  ;;  %286 = vpow2.f32 %v190_v36 }
  0xaa   :  { %v285_v39 = vpop.eup %284  ;;  %288 = vpow2.f32 %v195_v38 }
  0xaf   :  { %v287_v40 = vpop.eup %286 }
  0xb0   :  { %192 = vadd.xlane.f32.xlu1 %v287_v40  ;;  %v289_v41 = vpop.eup %288 }
  0xb1   :  { %182 = vadd.xlane.f32.xlu0 %v285_v39 }
  0xb8   :  { %197 = vadd.xlane.f32.xlu1 %v289_v41 }
 0x11c   :  { %v178_v43 = vpop.xlane.xlu0 %177 }
 0x123   :  { %v193_v44 = vpop.xlane.xlu1 %192 }
 0x124   :  { %v183_v46 = vpop.xlane.xlu0 %182 }
 0x125   :  { %v184_v47 = vadd.f32 %v183_v46, %v178_v43 }
 0x127   :  { %v185_v48 = vadd.f32 %v184_v47, %v173_v45 }
 0x129   :  { %187 = vst.msk [vmem:[#allocation3] sm:$0xff] %vm86_vm4, %v185_v48 }
 0x12b   :  { %v198_v50 = vpop.xlane.xlu1 %197 }
 0x12c   :  { %v199_v51 = vadd.f32 %v198_v50, %v193_v44 }
 0x12e   :  { %v200_v52 = vadd.f32 %v199_v51, %v188_v49 }
 0x130   :  { %201 = vst.msk [vmem:[#allocation4] sm:$0xff] %vm86_vm4, %v200_v52  ;;  %v205_v53 = vld [vmem:[#allocation3] sm:$0xff] }
 0x131   :  { %290 = vlog2.f32 %v205_v53 }
 0x137   :  { %v209_v54 = vld [vmem:[#allocation4] sm:$0xff]  ;;  %v291_v55 = vpop.eup %290 }
 0x138   :  { %292 = vlog2.f32 %v209_v54  ;;  %v207_v58 = vmul.f32 0.6931472, %v291_v55 }
 0x13a   :  { %v208_v62 = vadd.f32 10.0, %v207_v58 }
 0x13e   :  { %v293_v59 = vpop.eup %292 }
 0x13f   :  { %v211_v60 = vmul.f32 0.6931472, %v293_v59 }
 0x141   :  { %v212_v63 = vadd.f32 10.0, %v211_v60 }
 0x143   :  { %v221_v0 = vadd.f32 %v212_v63, %v208_v62 }
 0x145   :  { %v223_v1 = vsub.f32 %v221_v0, %v222_v61 }
 0x147   :  { %v225_v2 = vsel %vm86_vm4, %v223_v1, 0.0 }
 0x148   :  { %226 = vadd.xlane.f32.xlu2 %v225_v2 }
 0x1bb   :  { %v227_v3 = vpop.xlane.xlu2 %226 }
 0x1bc   :  { %v228_v4 = vrot.slane %v227_v3, 4 }
 0x1be   :  { %v229_v5 = vadd.f32 %v228_v4, %v227_v3 }
 0x1c0   :  { %v230_v6 = vrot.slane %v229_v5, 2 }
 0x1c2   :  { %v231_v7 = vadd.f32 %v230_v6, %v229_v5 }
 0x1c4   :  { %v232_v8 = vrot.slane %v231_v7, 1 }
 0x1c6   :  { %v233_v9 = vadd.f32 %v232_v8, %v231_v7 }
 0x1c8   :  { %272 = vpush %v233_v9 }
 0x1f9   :  { %s273_s12 = spop %272 }
 0x1fa   :  { %v235_v10 = vstv %s273_s12 }
 0x1fb   :  { %236 = vst [vmem:[#allocation13] sm:$0xff] %v235_v10 }
 0x1fc   :  { %247 = dma.vmem_to_hbm [thread:$0]  %s243_s3, 128, %s245_s11, [#allocation7]  }
 0x1fd   :  { %420 = dma.done.wait [#allocation7], 128  }
 0x1fe   :  { %421 = vsyncadd [#allocation7], 4294967168 }
 0x1ff   :  { %252 = vsyncpa [#allocation6], 1 }
 0x200   :  { %253 = vsyncpa [#allocation9], 1 }
 0x201   :  { %254 = vsyncpa [#allocation12], 1 }
 0x202   :  { %255 = vsyncpa [#allocation7], 1 }

</bundles_post_ra>
